<compile_context>
chip_gen: v7x
topology: tpu7x:2x2x1
jax: 0.10.0
libtpu: 0.0.40
codegen_flags: <defaults>
</compile_context>

<pallas_src>
import functools

import jax
import jax.numpy as jnp
from jax.experimental import pallas as pl
from jax.experimental.pallas import tpu as pltpu


_TILE_VMEM_BUDGET = 24 << 20   # target bytes for (double-buffered) tiles + weights
_WEIGHT_VMEM_CAP = 8 << 20     # keep all block weights resident if under this
_VMEM_LIMIT_BYTES = 40 << 20   # explicit scoped-VMEM limit: < v7x 64 MiB physical,
                               # > v5e/v6e 16/32 MiB defaults


def _round_up(x, m):
    return (x + m - 1) // m * m


def _fused_reversible_kernel(x_ref, wf_ref, bf_ref, wg_ref, bg_ref, o_ref,
                             *, weights_resident):
    """One grid step = one reversible block applied to the resident token tile.

    Grid = (row_tiles, n_blocks); the output block index is constant along the
    block axis, so o_ref is the VMEM-resident working buffer for the tile.
    """
    b = pl.program_id(1)
    d2 = wf_ref.shape[-1]

    # Load the token tile into the resident output buffer at the first block.
    @pl.when(b == 0)
    def _():
        o_ref[...] = x_ref[...]

    # Select this block's parameters (dynamic leading-axis index when all
    # block weights are resident; streamed weights have leading dim 1).
    w = b if weights_resident else 0
    wf = wf_ref[w]          # (d2, d2) bf16
    bf = bf_ref[w]          # (1, d2)  f32
    wg = wg_ref[w]          # (d2, d2) bf16
    bg = bg_ref[w]          # (1, d2)  f32

    # Lane-aligned halves of the resident tile (no concatenate anywhere).
    x1 = o_ref[:, :d2]
    x2 = o_ref[:, d2:]

    # y1 = x1 + f(x2);  f = tanh-GELU(Linear)   -- bf16 MXU, f32 accumulate.
    fx2 = jnp.dot(x2.astype(jnp.bfloat16), wf,
                  preferred_element_type=jnp.float32)
    y1 = x1 + jax.nn.gelu(fx2 + bf, approximate=True)

    # y2 = x2 + g(y1)
    gy1 = jnp.dot(y1.astype(jnp.bfloat16), wg,
                  preferred_element_type=jnp.float32)
    y2 = x2 + jax.nn.gelu(gy1 + bg, approximate=True)

    # Write the halves straight back into the resident buffer; the HBM
    # writeback happens only once per row tile (after the last block).
    o_ref[:, :d2] = y1.astype(o_ref.dtype)
    o_ref[:, d2:] = y2.astype(o_ref.dtype)


def _choose_row_tile(M, D, weight_vmem_bytes):
    """Largest row tile that fits the VMEM budget (double-buffered in + out)."""
    per_row = 4 * D * 4                       # 2 in bufs + 2 out bufs, f32
    avail = max(_TILE_VMEM_BUDGET - weight_vmem_bytes, per_row * 8)
    tm = max(8, min(1024, avail // per_row))
    if tm >= 128:
        tm = (tm // 128) * 128                # keep big tiles 128-row aligned
    else:
        tm = max(8, (tm // 8) * 8)
    tm = min(tm, _round_up(M, 8))             # never exceed (sublane-padded) M
    return int(tm)


def reversible_sequence_forward(x, params, *, row_tile=None):
    """ReversibleSequence.forward.

    x:      (B, S, D) float32, D even.
    params: list of (wf, bf, wg, bg) per block;
            wf/wg: (D/2, D/2), bf/bg: (1, D/2).
    """
    B, S, D = x.shape
    assert D % 2 == 0, "feature dim must be even for the reversible split"
    d2 = D // 2
    n_blocks = len(params)
    M = B * S

    # Stack & cast parameters once: weights bf16 for the MXU, biases f32.
    wf = jnp.stack([p[0] for p in params]).astype(jnp.bfloat16)   # (n, d2, d2)
    bf = jnp.stack([p[1] for p in params]).astype(jnp.float32)    # (n, 1, d2)
    wg = jnp.stack([p[2] for p in params]).astype(jnp.bfloat16)   # (n, d2, d2)
    bg = jnp.stack([p[3] for p in params]).astype(jnp.float32)    # (n, 1, d2)

    # Decide whether all block weights can live in VMEM for the whole grid
    # (x2 for the pipeline's double buffering).
    resident_bytes = 2 * (wf.size * 2 + wg.size * 2 + bf.size * 4 + bg.size * 4)
    weights_resident = resident_bytes <= _WEIGHT_VMEM_CAP
    streamed_bytes = 2 * (2 * d2 * d2 * 2 + 2 * d2 * 4)
    weight_vmem = resident_bytes if weights_resident else streamed_bytes

    tm = row_tile if row_tile is not None else _choose_row_tile(M, D, weight_vmem)
    tm = int(min(tm, _round_up(M, 8)))
    M_pad = _round_up(M, tm)

    x2d = x.reshape(M, D)
    if M_pad != M:
        x2d = jnp.pad(x2d, ((0, M_pad - M), (0, 0)))

    grid = (M_pad // tm, n_blocks)

    if weights_resident:
        wf_spec = pl.BlockSpec((n_blocks, d2, d2), lambda i, b: (0, 0, 0))
        bf_spec = pl.BlockSpec((n_blocks, 1, d2), lambda i, b: (0, 0, 0))
        wg_spec = pl.BlockSpec((n_blocks, d2, d2), lambda i, b: (0, 0, 0))
        bg_spec = pl.BlockSpec((n_blocks, 1, d2), lambda i, b: (0, 0, 0))
    else:
        wf_spec = pl.BlockSpec((1, d2, d2), lambda i, b: (b, 0, 0))
        bf_spec = pl.BlockSpec((1, 1, d2), lambda i, b: (b, 0, 0))
        wg_spec = pl.BlockSpec((1, d2, d2), lambda i, b: (b, 0, 0))
        bg_spec = pl.BlockSpec((1, 1, d2), lambda i, b: (b, 0, 0))

    kernel = functools.partial(_fused_reversible_kernel,
                               weights_resident=weights_resident)

    out = pl.pallas_call(
        kernel,
        out_shape=jax.ShapeDtypeStruct((M_pad, D), x.dtype),
        grid_spec=pltpu.PrefetchScalarGridSpec(
            num_scalar_prefetch=0,
            grid=grid,
            in_specs=[
                pl.BlockSpec((tm, D), lambda i, b: (i, 0)),   # token tile
                wf_spec, bf_spec, wg_spec, bg_spec,
            ],
            out_specs=pl.BlockSpec((tm, D), lambda i, b: (i, 0)),
        ),
        compiler_params=pltpu.CompilerParams(
            dimension_semantics=("parallel", "arbitrary"),
            vmem_limit_bytes=_VMEM_LIMIT_BYTES,
        ),
    )(x2d, wf, bf, wg, bg)

    return out[:M].reshape(B, S, D)


# ---------------------------------------------------------------------------
# Pure-JAX reference (identical math: bf16 matmul operands, f32 accumulation,
# tanh-GELU) for correctness checking.
# ---------------------------------------------------------------------------
def _reference_forward(x, params):
    B, S, D = x.shape
    d2 = D // 2
    h = x.reshape(B * S, D)
    for (wf, bf, wg, bg) in params:
        x1, x2 = h[:, :d2], h[:, d2:]
        fx2 = jnp.dot(x2.astype(jnp.bfloat16), wf.astype(jnp.bfloat16),
                      preferred_element_type=jnp.float32)
        y1 = x1 + jax.nn.gelu(fx2 + bf, approximate=True)
        gy1 = jnp.dot(y1.astype(jnp.bfloat16), wg.astype(jnp.bfloat16),
                      preferred_element_type=jnp.float32)
        y2 = x2 + jax.nn.gelu(gy1 + bg, approximate=True)
        h = jnp.concatenate([y1, y2], axis=-1)
    return h.reshape(B, S, D)


if __name__ == "__main__":
    key = jax.random.PRNGKey(0)

    # Small demo shapes; D = 256 so each half (d2 = 128) is lane-aligned.
    B, S, D = 2, 8, 256
    d2 = D // 2
    n_blocks = 3

    key, kx = jax.random.split(key)
    x = jax.random.normal(kx, (B, S, D), dtype=jnp.float32)

    # Deterministic per-block Linear parameters for f and g.
    params = []
    for _ in range(n_blocks):
        key, k1, k2, k3, k4 = jax.random.split(key, 5)
        wf_p = jax.random.normal(k1, (d2, d2), dtype=jnp.float32) * 0.1
        bf_p = jax.random.normal(k2, (1, d2), dtype=jnp.float32) * 0.01
        wg_p = jax.random.normal(k3, (d2, d2), dtype=jnp.float32) * 0.1
        bg_p = jax.random.normal(k4, (1, d2), dtype=jnp.float32) * 0.01
        params.append((wf_p, bf_p, wg_p, bg_p))

    out = reversible_sequence_forward(x, params)
    out = jax.block_until_ready(out)

    ref = _reference_forward(x, params)
    assert out.shape == (B, S, D) and out.dtype == jnp.float32
    max_err = jnp.max(jnp.abs(out - ref))
    assert jnp.allclose(out, ref, atol=1e-3, rtol=1e-3), (
        f"mismatch vs reference, max abs err = {max_err}")

    print("KERNEL_OK")
</pallas_src>

<mosaic_0001>
module attributes {stable_mosaic.version = 11 : i64} {
  func.func @_fused_reversible_kernel(%arg0: i32, %arg1: i32, %arg2: memref<16x256xf32, #tpu.memory_space<vmem>>, %arg3: memref<3x128x128xbf16, #tpu.memory_space<vmem>>, %arg4: memref<3x1x128xf32, #tpu.memory_space<vmem>>, %arg5: memref<3x128x128xbf16, #tpu.memory_space<vmem>>, %arg6: memref<3x1x128xf32, #tpu.memory_space<vmem>>, %arg7: memref<16x256xf32, #tpu.memory_space<vmem>>) attributes {dimension_semantics = [#tpu.dimension_semantics<parallel>, #tpu.dimension_semantics<arbitrary>], iteration_bounds = array<i64: 1, 3>, scalar_prefetch = 0 : i64, scratch_operands = 0 : i64, tpu.core_type = #tpu.core_type<tc>, window_params = [{transform_indices = @transform_0, window_bounds = array<i64: 16, 256>}, {pipeline_mode = #tpu.pipeline_mode<synchronous>, transform_indices = @transform_1, window_bounds = array<i64: 3, 128, 128>}, {pipeline_mode = #tpu.pipeline_mode<synchronous>, transform_indices = @transform_2, window_bounds = array<i64: 3, 1, 128>}, {pipeline_mode = #tpu.pipeline_mode<synchronous>, transform_indices = @transform_3, window_bounds = array<i64: 3, 128, 128>}, {pipeline_mode = #tpu.pipeline_mode<synchronous>, transform_indices = @transform_4, window_bounds = array<i64: 3, 1, 128>}, {transform_indices = @transform_5, window_bounds = array<i64: 16, 256>}]} {
    %c0_i32 = arith.constant 0 : i32
    %0 = arith.cmpi eq, %arg1, %c0_i32 : i32
    %1 = arith.extui %0 : i1 to i32
    %c0_i32_0 = arith.constant 0 : i32
    %2 = arith.cmpi ne, %1, %c0_i32_0 : i32
    scf.if %2 {
      %c0_24 = arith.constant 0 : index
      %c0_25 = arith.constant 0 : index
      %55 = vector.load %arg2[%c0_24, %c0_25] : memref<16x256xf32, #tpu.memory_space<vmem>>, vector<16x256xf32>
      %c0_26 = arith.constant 0 : index
      %c0_27 = arith.constant 0 : index
      %56 = vector.load %arg7[%c0_26, %c0_27] : memref<16x256xf32, #tpu.memory_space<vmem>>, vector<16x256xf32>
      tpu.vector_store %arg7[%c0_26, %c0_27], %55 {strides = array<i32>} : memref<16x256xf32, #tpu.memory_space<vmem>>, vector<16x256xf32>,
    } else {
    }
    %3 = arith.index_cast %arg1 : i32 to index
    %c0 = arith.constant 0 : index
    %c0_1 = arith.constant 0 : index
    %4 = vector.load %arg3[%3, %c0, %c0_1] : memref<3x128x128xbf16, #tpu.memory_space<vmem>>, vector<1x128x128xbf16>
    %5 = vector.shape_cast %4 : vector<1x128x128xbf16> to vector<128x128xbf16>
    %6 = arith.index_cast %arg1 : i32 to index
    %c0_2 = arith.constant 0 : index
    %c0_3 = arith.constant 0 : index
    %7 = vector.load %arg4[%6, %c0_2, %c0_3] : memref<3x1x128xf32, #tpu.memory_space<vmem>>, vector<1x1x128xf32>
    %8 = vector.shape_cast %7 : vector<1x1x128xf32> to vector<1x128xf32>
    %9 = arith.index_cast %arg1 : i32 to index
    %c0_4 = arith.constant 0 : index
    %c0_5 = arith.constant 0 : index
    %10 = vector.load %arg5[%9, %c0_4, %c0_5] : memref<3x128x128xbf16, #tpu.memory_space<vmem>>, vector<1x128x128xbf16>
    %11 = vector.shape_cast %10 : vector<1x128x128xbf16> to vector<128x128xbf16>
    %12 = arith.index_cast %arg1 : i32 to index
    %c0_6 = arith.constant 0 : index
    %c0_7 = arith.constant 0 : index
    %13 = vector.load %arg6[%12, %c0_6, %c0_7] : memref<3x1x128xf32, #tpu.memory_space<vmem>>, vector<1x1x128xf32>
    %14 = vector.shape_cast %13 : vector<1x1x128xf32> to vector<1x128xf32>
    %c0_8 = arith.constant 0 : index
    %c0_9 = arith.constant 0 : index
    %15 = vector.load %arg7[%c0_8, %c0_9] : memref<16x256xf32, #tpu.memory_space<vmem>>, vector<16x128xf32>
    %c0_10 = arith.constant 0 : index
    %c128 = arith.constant 128 : index
    %16 = vector.load %arg7[%c0_10, %c128] : memref<16x256xf32, #tpu.memory_space<vmem>>, vector<16x128xf32>
    %17 = arith.truncf %16 : vector<16x128xf32> to vector<16x128xbf16>
    %cst = arith.constant dense<0.000000e+00> : vector<16x128xf32>
    %18 = tpu.matmul %17, %5, %cst {dimension_numbers = #tpu.dot_dimension_numbers<[1], [0], [0], [1], [0, 0, 1, 1], [], []>} : vector<16x128xbf16>, vector<128x128xbf16>, vector<16x128xf32> -> vector<16x128xf32>
    %19 = vector.broadcast %8 : vector<1x128xf32> to vector<16x128xf32>
    %20 = arith.addf %18, %19 : vector<16x128xf32>
    %21 = arith.mulf %20, %20 : vector<16x128xf32>
    %22 = arith.mulf %20, %21 : vector<16x128xf32>
    %cst_11 = arith.constant 4.471500e-02 : f32
    %23 = vector.broadcast %cst_11 : f32 to vector<16x128xf32>
    %24 = arith.mulf %23, %22 : vector<16x128xf32>
    %25 = arith.addf %20, %24 : vector<16x128xf32>
    %cst_12 = arith.constant 0.797884583 : f32
    %26 = vector.broadcast %cst_12 : f32 to vector<16x128xf32>
    %27 = arith.mulf %26, %25 : vector<16x128xf32>
    %28 = math.tanh %27 : vector<16x128xf32>
    %cst_13 = arith.constant 1.000000e+00 : f32
    %29 = vector.broadcast %cst_13 : f32 to vector<16x128xf32>
    %30 = arith.addf %29, %28 : vector<16x128xf32>
    %cst_14 = arith.constant 5.000000e-01 : f32
    %31 = vector.broadcast %cst_14 : f32 to vector<16x128xf32>
    %32 = arith.mulf %31, %30 : vector<16x128xf32>
    %33 = arith.mulf %20, %32 : vector<16x128xf32>
    %34 = arith.addf %15, %33 : vector<16x128xf32>
    %35 = arith.truncf %34 : vector<16x128xf32> to vector<16x128xbf16>
    %cst_15 = arith.constant dense<0.000000e+00> : vector<16x128xf32>
    %36 = tpu.matmul %35, %11, %cst_15 {dimension_numbers = #tpu.dot_dimension_numbers<[1], [0], [0], [1], [0, 0, 1, 1], [], []>} : vector<16x128xbf16>, vector<128x128xbf16>, vector<16x128xf32> -> vector<16x128xf32>
    %37 = vector.broadcast %14 : vector<1x128xf32> to vector<16x128xf32>
    %38 = arith.addf %36, %37 : vector<16x128xf32>
    %39 = arith.mulf %38, %38 : vector<16x128xf32>
    %40 = arith.mulf %38, %39 : vector<16x128xf32>
    %cst_16 = arith.constant 4.471500e-02 : f32
    %41 = vector.broadcast %cst_16 : f32 to vector<16x128xf32>
    %42 = arith.mulf %41, %40 : vector<16x128xf32>
    %43 = arith.addf %38, %42 : vector<16x128xf32>
    %cst_17 = arith.constant 0.797884583 : f32
    %44 = vector.broadcast %cst_17 : f32 to vector<16x128xf32>
    %45 = arith.mulf %44, %43 : vector<16x128xf32>
    %46 = math.tanh %45 : vector<16x128xf32>
    %cst_18 = arith.constant 1.000000e+00 : f32
    %47 = vector.broadcast %cst_18 : f32 to vector<16x128xf32>
    %48 = arith.addf %47, %46 : vector<16x128xf32>
    %cst_19 = arith.constant 5.000000e-01 : f32
    %49 = vector.broadcast %cst_19 : f32 to vector<16x128xf32>
    %50 = arith.mulf %49, %48 : vector<16x128xf32>
    %51 = arith.mulf %38, %50 : vector<16x128xf32>
    %52 = arith.addf %16, %51 : vector<16x128xf32>
    %c0_20 = arith.constant 0 : index
    %c0_21 = arith.constant 0 : index
    %53 = vector.load %arg7[%c0_20, %c0_21] : memref<16x256xf32, #tpu.memory_space<vmem>>, vector<16x128xf32>
    tpu.vector_store %arg7[%c0_20, %c0_21], %34 {strides = array<i32>} : memref<16x256xf32, #tpu.memory_space<vmem>>, vector<16x128xf32>,
    %c0_22 = arith.constant 0 : index
    %c128_23 = arith.constant 128 : index
    %54 = vector.load %arg7[%c0_22, %c128_23] : memref<16x256xf32, #tpu.memory_space<vmem>>, vector<16x128xf32>
    tpu.vector_store %arg7[%c0_22, %c128_23], %52 {strides = array<i32>} : memref<16x256xf32, #tpu.memory_space<vmem>>, vector<16x128xf32>,
    return
  }
  func.func @transform_0(%arg0: i32, %arg1: i32) -> (i32, i32) {
    %c0_i32 = arith.constant 0 : i32
    %c0_i32_0 = arith.constant 0 : i32
    return %arg0, %c0_i32 : i32, i32
  }
  func.func @transform_1(%arg0: i32, %arg1: i32) -> (i32, i32, i32) {
    %c0_i32 = arith.constant 0 : i32
    %c0_i32_0 = arith.constant 0 : i32
    %c0_i32_1 = arith.constant 0 : i32
    %c0_i32_2 = arith.constant 0 : i32
    return %c0_i32, %c0_i32_0, %c0_i32_1 : i32, i32, i32
  }
  func.func @transform_2(%arg0: i32, %arg1: i32) -> (i32, i32, i32) {
    %c0_i32 = arith.constant 0 : i32
    %c0_i32_0 = arith.constant 0 : i32
    %c0_i32_1 = arith.constant 0 : i32
    %c0_i32_2 = arith.constant 0 : i32
    return %c0_i32, %c0_i32_0, %c0_i32_1 : i32, i32, i32
  }
  func.func @transform_3(%arg0: i32, %arg1: i32) -> (i32, i32, i32) {
    %c0_i32 = arith.constant 0 : i32
    %c0_i32_0 = arith.constant 0 : i32
    %c0_i32_1 = arith.constant 0 : i32
    %c0_i32_2 = arith.constant 0 : i32
    return %c0_i32, %c0_i32_0, %c0_i32_1 : i32, i32, i32
  }
  func.func @transform_4(%arg0: i32, %arg1: i32) -> (i32, i32, i32) {
    %c0_i32 = arith.constant 0 : i32
    %c0_i32_0 = arith.constant 0 : i32
    %c0_i32_1 = arith.constant 0 : i32
    %c0_i32_2 = arith.constant 0 : i32
    return %c0_i32, %c0_i32_0, %c0_i32_1 : i32, i32, i32
  }
  func.func @transform_5(%arg0: i32, %arg1: i32) -> (i32, i32) {
    %c0_i32 = arith.constant 0 : i32
    %c0_i32_0 = arith.constant 0 : i32
    return %arg0, %c0_i32 : i32, i32
  }
}

</mosaic_0001>

<bundles_post_ra>
// kernel: tpu_custom_call.1
= control target key start
LH: loop header
LB: loop body
LE: loop exit
PB: predicated region body
PF: predicated region fallthrough
CT: control target
= control target key end

     0   :  { %10 = vsyncpa [#allocation3], 0  ;;  %s1211_s0 = inlined_call_operand.hbm [shape: f32[16,256], index: 0, kind: input, shape index: {}]   ;;  %s1212_s1 = inlined_call_operand.hbm [shape: bf16[3,128,128], index: 1, kind: input, shape index: {}]   ;;  %s1213_s2 = inlined_call_operand.vmem [shape: f32[3,1,128], index: 2, kind: input, shape index: {}]   ;;  %s1214_s3 = inlined_call_operand.hbm [shape: bf16[3,128,128], index: 3, kind: input, shape index: {}]   ;;  %s1215_s4 = inlined_call_operand.vmem [shape: f32[3,1,128], index: 4, kind: input, shape index: {}]   ;;  %s1216_s5 = inlined_call_operand.hbm [shape: f32[16,256], index: 5, kind: output, shape index: {}]  }
   0x1   :  { %11 = vsyncpa [#allocation6], 0 }
   0x2   :  { %12 = vsyncpa [#allocation4], 0  ;;  %s1024_s18 = smov 0   ;;  %s1026_s19 = smov 0  }
   0x3   :  { %s1028_s20 = smov 0  }
   0x4 LB: > { %s982_s21 = smov [#allocation5]   ;;  %s647_s23 = sadd.s32 4294967295, %s980_s20   ;;  %s980_s20 = sphi %s1028_s20, %s18_s20   ;;  %s976_s19 = sphi %s1026_s19, %s1229_s19   ;;  %s972_s18 = sphi %s1024_s18, %s1228_s18  }
   0x5   : > { %s200_s22 = sshll.u32 %s982_s21, 4  ;;  %p648_p0 = scmp.ge.s32.totalorder %s980_s20, 1  ;;  %s1048_s22 = int_to_ptr.vmem [resolvable:$true] %s200_s22 }
   0x6   : > { %p171_p1 = scmp.lt.s32.totalorder %s980_s20, 4  ;;  %p1044_p2 = scmp.eq.s32.totalorder %s647_s23, 0 }
   0x7   : > { %s27_s27 = sadd.s32 1, %s976_s19  ;;  %s983_s29 = smov [#allocation2]  }
   0x8   : > { %s1220_s24 = scalar_select %p1044_p2, 1, 0 }
   0x9   : > { %p1050_p3 = pnand %p648_p0, %p171_p1  ;;  %p1063_p6 = scmp.ge.s32.totalorder %s27_s27, 3 }
   0xa   : > { %s187_s30 = sshll.u32 %s983_s29, 4  ;;  %s836_s8 = scalar_lea.hbm %s1212_s1, 3072  ;;  %s188_s30 = int_to_ptr.vmem [resolvable:$true] %s187_s30 }
   0xb   : > { %s1221_s25 = scalar_select %p1050_p3, 1, 0 }
   0xc   : > { %p758_p4 = pneg %p1050_p3  ;;  %p837_p7 = scmp.ne.s32.totalorder %s1212_s1, %s836_s8 }
   0xd   : > { %p843_p11 = scmp.lt.u32.totalorder %s836_s8, %s1212_s1 }
   0xe   : > { %p1058_p5 = pnand %p1044_p2, %p758_p4 }
  0x10   : > { %p1075_p8 = pneg %p1058_p5 }
  0x12   : > { %p839_p9 = pnand %p1075_p8, %p837_p7 }
  0x14   : > { %p840_p10 = pneg %p839_p9 }
  0x16   : > { %p845_p12 = pnand %p843_p11, %p840_p10 }
  0x18   : > { %848 = shalt.err (!%p845_p12)
}
  0x19   : > { %s849_s14 = scalar_lea.vmem %s1048_s22, 3072  ;;  %p857_p4 = scmp.lt.s32.totalorder %s1048_s22, %s1048_s22 }
  0x1a   : > { %p850_p13 = scmp.ne.s32.totalorder %s1048_s22, %s849_s14  ;;  %p858_p2 = scmp.lt.s32.totalorder %s849_s14, %s849_s14 }
  0x1c   : > { %p852_p0 = pnand %p850_p13, %p1075_p8  ;;  %p859_p7 = por %p858_p2, %p857_p4 }
  0x1e   : > { %p853_p1 = pneg %p852_p0 }
  0x20   : > { %p860_p9 = pnand %p859_p7, %p853_p1 }
  0x22   : > { %863 = shalt.err (!%p860_p9)
}
  0x23   : > { %s984_s15 = smov 64   ;;  %s985_s16 = smov 4  }
  0x24   : > { %764 = dma.hbm_to_vmem [thread:$0]  (!%p1058_p5), %s1212_s1, 3072, %s1048_s22, [#allocation6], %s984_s15, %s984_s15, %s985_s16  }
  0x25   : > { %s1231_s27 = smov (%p1063_p6, %s27_s27), 0  ;;  %s864_s7 = scalar_lea.hbm %s1211_s0, 512 }
  0x26   : > { %p865_p2 = scmp.ne.s32.totalorder %s1211_s0, %s864_s7  ;;  %p871_p12 = scmp.lt.u32.totalorder %s864_s7, %s1211_s0 }
  0x28   : > { %p867_p10 = pnand %p865_p2, %p1075_p8 }
  0x2a   : > { %p868_p11 = pneg %p867_p10 }
  0x2c   : > { %p873_p13 = pnand %p871_p12, %p868_p11 }
  0x2e   : > { %876 = shalt.err (!%p873_p13)
}
  0x2f   : > { %s877_s22 = scalar_lea.vmem %s188_s30, 512  ;;  %p885_p4 = scmp.lt.s32.totalorder %s188_s30, %s188_s30 }
  0x30   : > { %p878_p6 = scmp.ne.s32.totalorder %s188_s30, %s877_s22  ;;  %p886_p7 = scmp.lt.s32.totalorder %s877_s22, %s877_s22 }
  0x32   : > { %p880_p0 = pnand %p878_p6, %p1075_p8  ;;  %p887_p9 = por %p886_p7, %p885_p4 }
  0x34   : > { %p881_p1 = pneg %p880_p0 }
  0x36   : > { %p888_p3 = pnand %p887_p9, %p881_p1 }
  0x38   : > { %891 = shalt.err (!%p888_p3)
}
  0x39   : > { %s986_s28 = smov 256   ;;  %s987_s13 = smov 16  }
  0x3a   : > { %761 = dma.hbm_to_vmem [thread:$0]  (!%p1058_p5), %s1211_s0, 512, %s188_s30, [#allocation3], %s986_s28, %s986_s28, %s987_s13  }
  0x3b   : > { %s988_s21 = smov [#allocation7]   ;;  %s892_s8 = scalar_lea.hbm %s1214_s3, 3072 }
  0x3c   : > { %s216_s29 = sshll.u32 %s988_s21, 4  ;;  %p893_p3 = scmp.ne.s32.totalorder %s1214_s3, %s892_s8  ;;  %s217_s29 = int_to_ptr.vmem [resolvable:$true] %s216_s29 }
  0x3d   : > { %p899_p11 = scmp.lt.u32.totalorder %s892_s8, %s1214_s3 }
  0x3e   : > { %p895_p2 = pnand %p893_p3, %p1075_p8 }
  0x40   : > { %p896_p10 = pneg %p895_p2 }
  0x42   : > { %p901_p12 = pnand %p899_p11, %p896_p10 }
  0x44   : > { %904 = shalt.err (!%p901_p12)
}
  0x45   : > { %s905_s30 = scalar_lea.vmem %s217_s29, 3072  ;;  %p913_p1 = scmp.lt.s32.totalorder %s217_s29, %s217_s29 }
  0x46   : > { %p906_p13 = scmp.ne.s32.totalorder %s217_s29, %s905_s30  ;;  %p914_p4 = scmp.lt.s32.totalorder %s905_s30, %s905_s30 }
  0x48   : > { %p908_p6 = pnand %p906_p13, %p1075_p8  ;;  %p915_p7 = por %p914_p4, %p913_p1 }
  0x4a   : > { %p909_p0 = pneg %p908_p6 }
  0x4c   : > { %p916_p9 = pnand %p915_p7, %p909_p0 }
  0x4e   : > { %919 = shalt.err (!%p916_p9)
}
  0x4f   : > { %767 = dma.hbm_to_vmem [thread:$0]  (!%p1058_p5), %s1214_s3, 3072, %s217_s29, [#allocation6], %s984_s15, %s984_s15, %s985_s16  }
  0x50   : > { %p1225_p3 = scmp.ne.s32.totalorder %s1221_s25, 0 }
  0x51   : > { %p1226_p8 = scmp.ne.s32.totalorder (!%p1225_p3), %s1220_s24, 0 }
  0x52   : > { %235 = sbr.rel (%p1225_p3) target bundleno = 643 (0x283), region = 40 }
  0x59   : > { %959 = dma.done.wait (%p1226_p8), [#allocation3], 512  }
  0x5a   : > { %961 = vsyncadd (%p1226_p8), [#allocation3], 4294966784 }
  0x5b   : > { %963 = dma.done.wait (%p1226_p8), [#allocation6], 6144  }
  0x5c   : > { %965 = vsyncadd (%p1226_p8), [#allocation6], 4294961152  ;;  %p656_p2 = scmp.ne.s32.totalorder %s972_s18, 0 }
  0x5d   : > { %v268_v0 = vld [vmem:[#allocation2] sm:$0xff] (!%p656_p2)  ;;  %v269_v1 = vld [vmem:[#allocation2 + $0x8] sm:$0xff] (!%p656_p2)  ;;  %v270_v2 = vld [vmem:[#allocation2 + $0x10] sm:$0xff] (!%p656_p2) }
  0x5e   : > { %267 = sbr.rel (%p656_p2) target bundleno = 101 (0x65), region = 56  ;;  %272 = vst [vmem:[#allocation8] sm:$0xff] (!%p656_p2), %v268_v0  ;;  %273 = vst [vmem:[#allocation8 + $0x8] sm:$0xff] (!%p656_p2), %v269_v1  ;;  %v271_v3 = vld [vmem:[#allocation2 + $0x18] sm:$0xff] (!%p656_p2) }
  0x5f   : > { %274 = vst [vmem:[#allocation8 + $0x10] sm:$0xff] (!%p656_p2), %v270_v2  ;;  %275 = vst [vmem:[#allocation8 + $0x18] sm:$0xff] (!%p656_p2), %v271_v3 }
  0x65 PF: > { %s682_s25 = sshll.u32 %s972_s18, 6  ;;  %v989_v4 = vmov 0.0   ;;  %vm990_vm0 = vmmov 0   ;;  %v1156_v13 = vld [vmem:[#allocation8 + $0x8] sm:$0xff]  ;;  %s295_s16 = scalar_lea.vmem %s1213_s2, %s972_s18  ;;  %v317_v46 = vld [vmem:[#allocation8] sm:$0xff] }
  0x66   : > { %702 = vmatprep.subr.bf16.mxu0 %v989_v4  ;;  %718 = vmatprep.mubr.msk.bf16.mxu0 %vm990_vm0, %v989_v4  ;;  %s278_s24 = scalar_lea.vmem [#allocation5], %s682_s25  ;;  %v1158_v14 = vld [vmem:[#allocation8 + $0x18] sm:$0xff]  ;;  %s298_s26 = scalar_lea.vmem [#allocation7], %s682_s25  ;;  %v660_v24 = vld [vmem:[%s295_s16] ss:$0 sm:$0xff]  ;;  %v318_v49 = vld [vmem:[#allocation8 + $0x10] sm:$0xff] }
  0x67   : > { %v812_v5 = vld [vmem:[%s278_s24] sm:$0xff]   ;;  %722 = vmatprep.subr.bf16.mxu1 %v989_v4  ;;  %738 = vmatprep.mubr.msk.bf16.mxu1 %vm990_vm0, %v989_v4  ;;  %v813_v6 = vld [vmem:[%s278_s24 + $0x8] sm:$0xff]   ;;  %v814_v7 = vld [vmem:[%s278_s24 + $0x10] sm:$0xff]   ;;  %v321_v15 = vpack.c.bf16 %v1158_v14, %v1156_v13  ;;  %s315_s21 = scalar_lea.vmem %s1215_s4, %s972_s18  ;;  %s991_s18 = smov [#allocation8]  }
  0x68   : > { %703 = vmatpush3.bf16.msra.mxu0 %v812_v5  ;;  %v815_v8 = vld [vmem:[%s278_s24 + $0x18] sm:$0xff]   ;;  %v816_v9 = vld [vmem:[%s278_s24 + $0x20] sm:$0xff]   ;;  %v817_v10 = vld [vmem:[%s278_s24 + $0x28] sm:$0xff]   ;;  %s567_s29 = sshll.u32 %s991_s18, 4  ;;  %p1175_p5 = scmp.eq.s32.totalorder %s647_s23, 2  ;;  %s568_s29 = int_to_ptr.vmem [resolvable:$true] %s567_s29 }
  0x69   : > { %704 = vmatprep.subr.bf16.mxu0 %v989_v4  ;;  %v818_v11 = vld [vmem:[%s278_s24 + $0x30] sm:$0xff]   ;;  %v819_v12 = vld [vmem:[%s278_s24 + $0x38] sm:$0xff]   ;;  %v820_v16 = vld [vmem:[%s298_s26] sm:$0xff]   ;;  %s920_s7 = scalar_lea.vmem %s568_s29, 512  ;;  %p927_p13 = scmp.lt.s32.totalorder %s568_s29, %s568_s29 }
  0x6a   : > { %723 = vmatpush3.bf16.msra.mxu1 %v820_v16  ;;  %v821_v17 = vld [vmem:[%s298_s26 + $0x8] sm:$0xff]   ;;  %v822_v18 = vld [vmem:[%s298_s26 + $0x10] sm:$0xff]   ;;  %v823_v19 = vld [vmem:[%s298_s26 + $0x18] sm:$0xff]   ;;  %p921_p10 = scmp.ne.s32.totalorder %s568_s29, %s920_s7  ;;  %p928_p6 = scmp.lt.s32.totalorder %s920_s7, %s920_s7 }
  0x6b   : > { %724 = vmatprep.subr.bf16.mxu1 %v989_v4  ;;  %v824_v20 = vld [vmem:[%s298_s26 + $0x20] sm:$0xff]   ;;  %v825_v21 = vld [vmem:[%s298_s26 + $0x28] sm:$0xff]   ;;  %v826_v22 = vld [vmem:[%s298_s26 + $0x30] sm:$0xff]  }
  0x6c   : > { %705 = vmatpush3.bf16.msra.mxu0 %v813_v6  ;;  %v827_v23 = vld [vmem:[%s298_s26 + $0x38] sm:$0xff]   ;;  %v669_v54 = vld [vmem:[%s315_s21] ss:$0 sm:$0xff]  ;;  %p922_p11 = pnand %p921_p10, %p1175_p5  ;;  %p929_p0 = por %p928_p6, %p927_p13 }
  0x6d   : > { %706 = vmatprep.subr.bf16.mxu0 %v989_v4 }
  0x6e   : > { %725 = vmatpush3.bf16.msra.mxu1 %v821_v17  ;;  %p923_p12 = pneg %p922_p11 }
  0x6f   : > { %726 = vmatprep.subr.bf16.mxu1 %v989_v4 }
  0x70   : > { %707 = vmatpush3.bf16.msra.mxu0 %v814_v7  ;;  %p930_p1 = pnand %p929_p0, %p923_p12 }
  0x71   : > { %708 = vmatprep.subr.bf16.mxu0 %v989_v4 }
  0x72   : > { %727 = vmatpush3.bf16.msra.mxu1 %v822_v18 }
  0x73   : > { %728 = vmatprep.subr.bf16.mxu1 %v989_v4 }
  0x74   : > { %709 = vmatpush3.bf16.msra.mxu0 %v815_v8 }
  0x75   : > { %710 = vmatprep.subr.bf16.mxu0 %v989_v4 }
  0x76   : > { %729 = vmatpush3.bf16.msra.mxu1 %v823_v19 }
  0x77   : > { %730 = vmatprep.subr.bf16.mxu1 %v989_v4 }
  0x78   : > { %711 = vmatpush3.bf16.msra.mxu0 %v816_v9 }
  0x79   : > { %712 = vmatprep.subr.bf16.mxu0 %v989_v4 }
  0x7a   : > { %731 = vmatpush3.bf16.msra.mxu1 %v824_v20 }
  0x7b   : > { %732 = vmatprep.subr.bf16.mxu1 %v989_v4 }
  0x7c   : > { %713 = vmatpush3.bf16.msra.mxu0 %v817_v10 }
  0x7d   : > { %714 = vmatprep.subr.bf16.mxu0 %v989_v4 }
  0x7e   : > { %733 = vmatpush3.bf16.msra.mxu1 %v825_v21 }
  0x7f   : > { %734 = vmatprep.subr.bf16.mxu1 %v989_v4 }
  0x80   : > { %715 = vmatpush3.bf16.msra.mxu0 %v818_v11 }
  0x81   : > { %716 = vmatprep.subr.bf16.mxu0 %v989_v4 }
  0x82   : > { %735 = vmatpush3.bf16.msra.mxu1 %v826_v22 }
  0x83   : > { %736 = vmatprep.subr.bf16.mxu1 %v989_v4 }
  0x84   : > { %717 = vmatpush3.bf16.msra.mxu0 %v819_v12 }
  0x86   : > { %737 = vmatpush3.bf16.msra.mxu1 %v827_v23 }
  0x87   : > { %719 = vmatmul.mubr.bf16.vlgmr.msra.gmra.mrb[0].mxu0 %v321_v15 }
 0x15a   : > { %v410_v25 = vpop.f32.mrb[0].mxu0 }
 0x15b   : > { %v411_v26 = vadd.f32 %v660_v24, %v410_v25  ;;  %v720_v27 = vpop.f32.mrb[1].mxu0 }
 0x15c   : > { %v413_v28 = vpop.f32.mrb[2].mxu0 }
 0x15d   : > { %v417_v29 = vmul.f32 %v411_v26, %v411_v26  ;;  %v414_v30 = vadd.f32 %v660_v24, %v413_v28  ;;  %v721_v31 = vpop.f32.mrb[3].mxu0 }
 0x15f   : > { %v419_v32 = vmul.f32 %v417_v29, %v411_v26  ;;  %v418_v33 = vmul.f32 %v414_v30, %v414_v30 }
 0x161   : > { %v421_v34 = vmul.f32 0.044715, %v419_v32  ;;  %v420_v35 = vmul.f32 %v418_v33, %v414_v30 }
 0x163   : > { %v423_v36 = vadd.f32 %v421_v34, %v411_v26  ;;  %v422_v37 = vmul.f32 0.044715, %v420_v35 }
 0x165   : > { %v425_v38 = vmul.f32 0.7978846, %v423_v36  ;;  %v424_v39 = vadd.f32 %v422_v37, %v414_v30 }
 0x167   : > { %828 = vtanh.f32 %v425_v38  ;;  %v426_v40 = vmul.f32 0.7978846, %v424_v39 }
 0x169   : > { %830 = vtanh.f32 %v426_v40 }
 0x171   : > { %v829_v41 = vpop.eup %828 }
 0x172   : > { %v429_v42 = vadd.f32 1.0, %v829_v41 }
 0x173   : > { %v831_v43 = vpop.eup %830 }
 0x174   : > { %v430_v44 = vadd.f32 1.0, %v831_v43  ;;  %v431_v45 = vmul.f32 0.5, %v429_v42 }
 0x176   : > { %v432_v47 = vmul.f32 0.5, %v430_v44  ;;  %v433_v48 = vmul.f32 %v431_v45, %v411_v26 }
 0x178   : > { %v434_v50 = vmul.f32 %v432_v47, %v414_v30  ;;  %v435_v51 = vadd.f32 %v433_v48, %v317_v46 }
 0x17a   : > { %v436_v52 = vadd.f32 %v434_v50, %v318_v49  ;;  %553 = vst [vmem:[#allocation8] sm:$0xff] %v435_v51 }
 0x17c   : > { %v437_v53 = vpack.c.bf16 %v436_v52, %v435_v51  ;;  %554 = vst [vmem:[#allocation8 + $0x10] sm:$0xff] %v436_v52 }
 0x17e   : > { %739 = vmatmul.mubr.bf16.vlgmr.msra.gmra.mrb[0].mxu1 %v437_v53 }
 0x251   : > { %v526_v55 = vpop.f32.mrb[0].mxu1 }
 0x252   : > { %v527_v56 = vadd.f32 %v669_v54, %v526_v55  ;;  %v740_v57 = vpop.f32.mrb[1].mxu1 }
 0x253   : > { %v529_v58 = vpop.f32.mrb[2].mxu1 }
 0x254   : > { %v533_v59 = vmul.f32 %v527_v56, %v527_v56  ;;  %v530_v60 = vadd.f32 %v669_v54, %v529_v58  ;;  %v741_v61 = vpop.f32.mrb[3].mxu1 }
 0x256   : > { %v535_v62 = vmul.f32 %v533_v59, %v527_v56  ;;  %v534_v63 = vmul.f32 %v530_v60, %v530_v60 }
 0x258   : > { %v537_v0 = vmul.f32 0.044715, %v535_v62  ;;  %v536_v1 = vmul.f32 %v534_v63, %v530_v60 }
 0x25a   : > { %v539_v2 = vadd.f32 %v537_v0, %v527_v56  ;;  %v538_v3 = vmul.f32 0.044715, %v536_v1 }
 0x25c   : > { %v541_v4 = vmul.f32 0.7978846, %v539_v2  ;;  %v540_v5 = vadd.f32 %v538_v3, %v530_v60 }
 0x25e   : > { %832 = vtanh.f32 %v541_v4  ;;  %v542_v6 = vmul.f32 0.7978846, %v540_v5 }
 0x260   : > { %834 = vtanh.f32 %v542_v6 }
 0x268   : > { %v833_v7 = vpop.eup %832 }
 0x269   : > { %v545_v8 = vadd.f32 1.0, %v833_v7 }
 0x26a   : > { %v835_v9 = vpop.eup %834 }
 0x26b   : > { %v547_v10 = vmul.f32 0.5, %v545_v8  ;;  %v546_v11 = vadd.f32 1.0, %v835_v9 }
 0x26d   : > { %v549_v12 = vmul.f32 %v547_v10, %v527_v56  ;;  %v548_v15 = vmul.f32 0.5, %v546_v11 }
 0x26f   : > { %v551_v16 = vadd.f32 %v549_v12, %v1156_v13  ;;  %v550_v17 = vmul.f32 %v548_v15, %v530_v60 }
 0x271   : > { %555 = vst [vmem:[#allocation8 + $0x8] sm:$0xff] %v551_v16  ;;  %v552_v18 = vadd.f32 %v550_v17, %v1158_v14 }
 0x273   : > { %556 = vst [vmem:[#allocation8 + $0x18] sm:$0xff] %v552_v18 }
 0x274   : > { %933 = shalt.err (!%p930_p1)
}
 0x275   : > { %s934_s9 = scalar_lea.hbm %s1216_s5, 512 }
 0x276   : > { %p935_p4 = scmp.ne.s32.totalorder %s1216_s5, %s934_s9  ;;  %p940_p3 = scmp.lt.u32.totalorder %s934_s9, %s1216_s5 }
 0x278   : > { %p936_p7 = pnand %p935_p4, %p1175_p5 }
 0x27a   : > { %p937_p9 = pneg %p936_p7 }
 0x27c   : > { %p942_p8 = pnand %p940_p3, %p937_p9 }
 0x27e   : > { %945 = shalt.err (!%p942_p8)
}
 0x27f   : > { %s992_s28 = smov 256   ;;  %s993_s13 = smov 16  }
 0x280   : > { %755 = dma.vmem_to_hbm [thread:$0]  (%p1175_p5), %s568_s29, 512, %s1216_s5, [#allocation4], %s992_s28, %s992_s28, %s993_s13  }
 0x281   : > { %967 = dma.done.wait (%p1175_p5), [#allocation4], 512  }
 0x282   : > { %969 = vsyncadd (%p1175_p5), [#allocation4], 4294966784 }
 0x283 PF: > { %s18_s20 = sadd.s32 1, %s980_s20   ;;  %s1228_s18 = smov %s976_s19 }
 0x284   : > { %p15_p2 = scmp.ge.s32.totalorder %s18_s20, 5   ;;  %s1229_s19 = smov %s1231_s27 }
 0x286   :  { %17 = sbr.rel (!%p15_p2) target bundleno = 4 (0x4), region = 87 }
 0x28d   :  { %583 = vsyncpa [#allocation3], 1 }
 0x28e   :  { %585 = vsyncpa [#allocation3 + $0x1], 1 }
 0x28f   :  { %586 = vsyncpa [#allocation6], 1 }
 0x290   :  { %587 = vsyncpa [#allocation4], 1 }
 0x291   :  { %589 = vsyncpa [#allocation4 + $0x1], 1 }

</bundles_post_ra>
